<compile_context>
chip_gen: v6e
topology: v6e:2x2x1
jax: 0.10.0
libtpu: 0.0.40
codegen_flags: <defaults>
</compile_context>

<pallas_src>
import functools

import jax
import jax.numpy as jnp
import numpy as np
from jax import lax
from jax.experimental import pallas as pl
from jax.experimental.pallas import tpu as pltpu

BN_EPS = 1e-5


def _round_up(x, m):
    return (x + m - 1) // m * m


# ---------------------------------------------------------------------------
# Tile-size selection
# ---------------------------------------------------------------------------
def _pick_tm(M, Kp, Cp, tm_max=1024, vmem_budget=12 << 20):
    """Row-tile size: as large as fits the VMEM budget, a multiple of 16 (bf16
    sublane packing) unless it is the full (padded) extent, and split into >=2
    tiles when M allows it so the "parallel" M axis can be sharded across the
    two TensorCores of a v7x chip."""
    tm = min(tm_max, _round_up(M, 8))
    if _round_up(M, tm) // tm < 2 and M >= 32:
        tm = _round_up((M + 1) // 2, 16)

    def est(t):
        return (2 * t * Kp * 2        # double-buffered bf16 patch tiles
                + Kp * Cp * 2         # resident bf16 weights
                + 2 * 2 * Kp * 4      # scale/shift rows (f32)
                + t * Kp * 6          # f32 upcast + activated bf16 VPU temps
                + 2 * t * Cp * 4      # f32 accumulator / bf16 output
                + 2 * 2 * Cp * 4)     # stats

    while est(tm) > vmem_budget and tm > 16:
        tm = max(16, _round_up(tm // 2, 16))
    return tm


# ---------------------------------------------------------------------------
# Pallas kernel 1: fused [BN+ReLU of input] + conv-as-matmul + BN-stat epilogue
#   grid = (m_tiles,)  ("parallel"); full K in a single resident block.
# ---------------------------------------------------------------------------
def _fused_conv_kernel(p_ref, w_ref, sc_ref, sh_ref, y_ref, s_ref, *, apply_act):
    if apply_act:
        # Previous layer's BatchNorm scale/shift (tiled k*k times along K) and
        # ReLU, applied on the VPU in f32 (v5e has no bf16 VPU), then cast to
        # bf16 for the MXU.
        a = jnp.maximum(
            p_ref[...].astype(jnp.float32) * sc_ref[...] + sh_ref[...], 0.0)
        a = a.astype(jnp.bfloat16)
    else:
        a = p_ref[...]
    y = jnp.dot(a, w_ref[...], preferred_element_type=jnp.float32)
    y_ref[...] = y.astype(y_ref.dtype)
    # Per-tile partial BatchNorm statistics.  Padded rows of the patches were
    # filled so that `a` (and hence y) is exactly zero there, so no masking is
    # required; padded channel columns have zero weights and contribute zero.
    s0 = jnp.sum(y, axis=0, keepdims=True)          # (1, Cp)
    s1 = jnp.sum(y * y, axis=0, keepdims=True)      # (1, Cp)
    s_ref[...] = jnp.concatenate([s0, s1], axis=0)[None]   # (1, 2, Cp)


def _conv_matmul_stats(patches, wmat, sc_k, sh_k, row_fill, *, apply_act,
                       tm_max=1024):
    """patches (M,K) bf16; wmat (K,Cout) f32; sc_k/sh_k (K,) f32 (BN affine of
    the *input* activation, tiled k*k times; ignored when apply_act=False);
    row_fill (K,) f32 fill that maps to exactly 0 after the in-kernel BN+ReLU.

    Returns y (Mp,Cp) bf16, stats (m_tiles,2,Cp) f32, Mp, Cp, tm."""
    M, K = patches.shape
    Kw, Cout = wmat.shape
    assert K == Kw
    Cp = _round_up(Cout, 128)
    Kp = _round_up(K, 128)
    tm = _pick_tm(M, Kp, Cp, tm_max)
    Mp = _round_up(M, tm)
    m_tiles = Mp // tm

    # Row padding M -> Mp with a fill value that the in-kernel activation maps
    # to exactly 0 (zeros when apply_act=False), so padded rows contribute
    # nothing to the BatchNorm statistics.  K padding hits zero weight rows.
    if Mp > M:
        fill = jnp.broadcast_to(row_fill.astype(jnp.bfloat16)[None, :],
                                (Mp - M, K))
        patches = jnp.concatenate([patches, fill], axis=0)
    p_pad = jnp.pad(patches, ((0, 0), (0, Kp - K)))
    w_pad = jnp.pad(wmat.astype(jnp.bfloat16), ((0, Kp - K), (0, Cp - Cout)))
    sc_pad = jnp.pad(sc_k.astype(jnp.float32), (0, Kp - K),
                     constant_values=1.0).reshape(1, Kp)
    sh_pad = jnp.pad(sh_k.astype(jnp.float32), (0, Kp - K)).reshape(1, Kp)

    kern = functools.partial(_fused_conv_kernel, apply_act=apply_act)
    y, stats = pl.pallas_call(
        kern,
        out_shape=(jax.ShapeDtypeStruct((Mp, Cp), jnp.bfloat16),
                   jax.ShapeDtypeStruct((m_tiles, 2, Cp), jnp.float32)),
        grid_spec=pltpu.PrefetchScalarGridSpec(
            num_scalar_prefetch=0,
            grid=(m_tiles,),
            in_specs=[
                pl.BlockSpec((tm, Kp), lambda i: (i, 0)),   # patches tile
                pl.BlockSpec((Kp, Cp), lambda i: (0, 0)),   # resident weights
                pl.BlockSpec((1, Kp), lambda i: (0, 0)),    # BN scale (tiled)
                pl.BlockSpec((1, Kp), lambda i: (0, 0)),    # BN shift (tiled)
            ],
            out_specs=(
                pl.BlockSpec((tm, Cp), lambda i: (i, 0)),
                pl.BlockSpec((1, 2, Cp), lambda i: (i, 0, 0)),
            ),
        ),
        compiler_params=pltpu.CompilerParams(
            dimension_semantics=("parallel",),
            # Tile picker keeps the working set <= 12 MiB; 32 MiB limit gives
            # >2x headroom and stays inside v7x's 64 MiB physical VMEM.
            vmem_limit_bytes=32 * 1024 * 1024),
    )(p_pad, w_pad, sc_pad, sh_pad)
    return y, stats, Mp, Cp, tm


# ---------------------------------------------------------------------------
# Pallas kernel 2: fused BatchNorm + ReLU + 1x1 predict conv (Cout=1)
# ---------------------------------------------------------------------------
def _bn_relu_predict_kernel(y_ref, sc_ref, sh_ref, pw_ref, o_ref):
    a = jnp.maximum(
        y_ref[...].astype(jnp.float32) * sc_ref[...] + sh_ref[...], 0.0)
    # TODO(synk): lane-dense (1, tm) output layout for large M to avoid masked
    #             vst partial stores; negligible for this configuration.
    o_ref[...] = jnp.sum(a * pw_ref[...], axis=-1, keepdims=True)


def _bn_relu_predict(y, scale, shift, pw, tm):
    Mp, Cp = y.shape
    m_tiles = Mp // tm
    return pl.pallas_call(
        _bn_relu_predict_kernel,
        out_shape=jax.ShapeDtypeStruct((Mp, 1), jnp.float32),
        grid_spec=pltpu.PrefetchScalarGridSpec(
            num_scalar_prefetch=0,
            grid=(m_tiles,),
            in_specs=[pl.BlockSpec((tm, Cp), lambda i: (i, 0)),
                      pl.BlockSpec((1, Cp), lambda i: (0, 0)),
                      pl.BlockSpec((1, Cp), lambda i: (0, 0)),
                      pl.BlockSpec((1, Cp), lambda i: (0, 0))],
            out_specs=pl.BlockSpec((tm, 1), lambda i: (i, 0)),
        ),
        compiler_params=pltpu.CompilerParams(
            dimension_semantics=("parallel",),
            vmem_limit_bytes=32 * 1024 * 1024),
    )(y, scale.reshape(1, Cp), shift.reshape(1, Cp), pw.reshape(1, Cp))


# ---------------------------------------------------------------------------
# Glue: patch extraction (static strided slices), layer composition
# ---------------------------------------------------------------------------
def _extract_patches(src_nhwc, k, stride, pad_vals):
    """Patch extraction as a static (kh,kw) loop of strided slices (no gather).

    src_nhwc: (N,H,W,C); pad_vals: None (zero padding) or (C,) f32 per-channel
    spatial halo value (pre-BN value that maps to 0 after the consumer's
    BN+ReLU).  Returns (patches (N*Ho*Wo, k*k*C) bf16 in (kh,kw,c) feature
    order, Ho, Wo)."""
    N, H, W, C = src_nhwc.shape
    pad = (k - 1) // 2
    xp = jnp.pad(src_nhwc, ((0, 0), (pad, pad), (pad, pad), (0, 0)))
    if pad_vals is not None and pad > 0:
        hh = jnp.arange(H + 2 * pad)
        ww = jnp.arange(W + 2 * pad)
        interior = (((hh >= pad) & (hh < pad + H))[:, None]
                    & ((ww >= pad) & (ww < pad + W))[None, :])
        xp = jnp.where(interior[None, :, :, None], xp,
                       pad_vals.astype(xp.dtype)[None, None, None, :])
    xp = xp.astype(jnp.bfloat16)
    Ho = (H + 2 * pad - k) // stride + 1
    Wo = (W + 2 * pad - k) // stride + 1
    cols = []
    for dh in range(k):
        for dw in range(k):
            cols.append(lax.slice(
                xp, (0, dh, dw, 0),
                (N, dh + (Ho - 1) * stride + 1, dw + (Wo - 1) * stride + 1, C),
                (1, stride, stride, 1)))
    patches = jnp.concatenate(cols, axis=-1)          # (N,Ho,Wo,k*k*C)
    return patches.reshape(N * Ho * Wo, k * k * C), Ho, Wo


def _fused_layer(src_nhwc, src_scale, src_shift, w, gamma, beta, k):
    """One discriminator block: conv(act(src), w, stride=2, pad=(k-1)//2).
    `act` is BN(src_scale, src_shift)+ReLU applied *inside* the conv kernel
    (identity for the first layer).  The conv bias is dropped: it cancels
    exactly under the following train-mode BatchNorm.  Returns the pre-BN conv
    output y (padded, bf16), this layer's BN (scale, shift), and geometry."""
    N, H, W, Cin = src_nhwc.shape
    Cout, Cin_w, kh, kw = w.shape
    assert (Cin_w, kh, kw) == (Cin, k, k)
    apply_act = src_scale is not None
    if apply_act:
        safe = jnp.where(src_scale != 0, src_scale, 1.0)
        # Pre-BN value that maps to <= -1e3 after x*scale+shift, so ReLU gives
        # exactly 0 even after bf16 rounding of the fill value.  (Degenerate
        # scale==0 channels map every value to relu(shift) anyway.)
        pad_vals = jnp.where(src_scale != 0, (-src_shift - 1e3) / safe, 0.0)
        sc_k = jnp.tile(src_scale, k * k)
        sh_k = jnp.tile(src_shift, k * k)
        row_fill = jnp.tile(pad_vals, k * k)
    else:
        pad_vals = None
        sc_k = jnp.ones((k * k * Cin,), jnp.float32)
        sh_k = jnp.zeros((k * k * Cin,), jnp.float32)
        row_fill = jnp.zeros((k * k * Cin,), jnp.float32)

    patches, Ho, Wo = _extract_patches(src_nhwc, k, 2, pad_vals)
    M = N * Ho * Wo
    # PyTorch weight (Cout,Cin,kh,kw) -> (kh*kw*Cin, Cout), matching patch order
    wmat = jnp.transpose(w, (2, 3, 1, 0)).reshape(k * k * Cin, Cout)

    y, stats, Mp, Cp, tm = _conv_matmul_stats(
        patches, wmat, sc_k, sh_k, row_fill, apply_act=apply_act)

    # Tiny (2, Cp) combine of per-tile partial stats (training-mode BN, biased
    # variance, matching PyTorch).  The conv bias cancels here exactly.
    # TODO(synk): E[x^2]-E[x]^2 is cancellation-prone for badly-scaled inputs;
    #             switch to a two-pass / Welford combine if that matters.
    tot = stats.sum(axis=0)                           # (2, Cp)
    mean = tot[0] / M
    var = jnp.maximum(tot[1] / M - mean * mean, 0.0)
    inv = lax.rsqrt(var + BN_EPS)
    g = jnp.pad(gamma.astype(jnp.float32), (0, Cp - Cout))
    be = jnp.pad(beta.astype(jnp.float32), (0, Cp - Cout))
    scale = g * inv
    shift = be - mean * scale
    return y, scale, shift, (N, Ho, Wo), M, Cout, Cp, tm


def dcgan_patch_discriminator(x_nchw, params, kernel_size):
    x = jnp.transpose(x_nchw, (0, 2, 3, 1)).astype(jnp.float32)   # -> NHWC
    layers = params["layers"]
    src = x
    src_scale = None
    src_shift = None
    pred = None
    N = Ho = Wo = None
    for li, (w, _bias, gamma, beta) in enumerate(layers):   # bias cancels in BN
        y, scale, shift, (N, Ho, Wo), M, Cout, Cp, tm = _fused_layer(
            src, src_scale, src_shift, w, gamma, beta, kernel_size)
        if li < len(layers) - 1:
            # Carry the pre-BN activation (bf16) + its BN affine; BN+ReLU is
            # applied inside the next conv kernel.  Channels are sliced back to
            # Cout so the next layer's K (= k*k*Cin) is not inflated by padding.
            src = y[:M, :Cout].reshape(N, Ho, Wo, Cout)
            src_scale = scale[:Cout]
            src_shift = shift[:Cout]
        else:
            pw = jnp.pad(params["pred_w"].reshape(-1).astype(jnp.float32),
                         (0, Cp - Cout))
            pred = _bn_relu_predict(y, scale, shift, pw, tm)      # (Mp, 1)
            pred = pred[:M] + params["pred_b"].astype(jnp.float32)
    # PyTorch: out.reshape(N,1,Hf*Wf).permute(2,0,1).reshape(-1,1)
    return pred.reshape(N, Ho * Wo).T.reshape(-1, 1)


# ---------------------------------------------------------------------------
# Pure-JAX f32 reference (lax.conv) for correctness checking
# ---------------------------------------------------------------------------
def ref_forward(x_nchw, params, k):
    x = x_nchw.astype(jnp.float32)
    pad = (k - 1) // 2
    for (w, b, g, be) in params["layers"]:
        x = lax.conv_general_dilated(
            x, w, (2, 2), [(pad, pad), (pad, pad)],
            dimension_numbers=("NCHW", "OIHW", "NCHW"))
        x = x + b[None, :, None, None]
        mean = x.mean(axis=(0, 2, 3), keepdims=True)
        var = x.var(axis=(0, 2, 3), keepdims=True)
        x = (x - mean) * lax.rsqrt(var + BN_EPS) * g[None, :, None, None] \
            + be[None, :, None, None]
        x = jnp.maximum(x, 0.0)
    x = lax.conv_general_dilated(
        x, params["pred_w"], (1, 1), [(0, 0), (0, 0)],
        dimension_numbers=("NCHW", "OIHW", "NCHW"))
    x = x + params["pred_b"][None, :, None, None]
    N, _, Hf, Wf = x.shape
    return jnp.transpose(x.reshape(N, 1, Hf * Wf), (2, 0, 1)).reshape(-1, 1)


# ---------------------------------------------------------------------------
# Deterministic parameter construction (shapes per the module's __init__)
# ---------------------------------------------------------------------------
def make_params(key, in_size, base_channels, channel_factors, kernel_size):
    chans = [in_size] + [base_channels * f for f in channel_factors]
    layers = []
    for cin, cout in zip(chans[:-1], chans[1:]):
        key, k1, k2 = jax.random.split(key, 3)
        w = 0.05 * jax.random.normal(k1, (cout, cin, kernel_size, kernel_size),
                                     jnp.float32)
        b = 0.05 * jax.random.normal(k2, (cout,), jnp.float32)
        gamma = jnp.ones((cout,), jnp.float32)   # BatchNorm2d default init
        beta = jnp.zeros((cout,), jnp.float32)
        layers.append((w, b, gamma, beta))
    key, k1, k2 = jax.random.split(key, 3)
    pred_w = 0.05 * jax.random.normal(k1, (1, chans[-1], 1, 1), jnp.float32)
    pred_b = 0.05 * jax.random.normal(k2, (1,), jnp.float32)
    return {"layers": layers, "pred_w": pred_w, "pred_b": pred_b}


if __name__ == "__main__":
    # Small config: in_size=4, base_channels=8, channel_factors=[2, 4], k=5
    in_size, base_channels, channel_factors, kernel_size = 4, 8, [2, 4], 5
    key = jax.random.PRNGKey(0)
    key, kx = jax.random.split(key)
    x = jax.random.normal(kx, (2, in_size, 16, 16), jnp.float32)   # NCHW input

    params = make_params(key, in_size, base_channels, channel_factors,
                         kernel_size)

    fwd = jax.jit(functools.partial(dcgan_patch_discriminator,
                                    kernel_size=kernel_size))
    out = jax.block_until_ready(fwd(x, params))
    ref = jax.block_until_ready(ref_forward(x, params, kernel_size))

    # Final spatial: 16 -> 8 -> 4, so output is (Hf*Wf*N, 1) = (32, 1)
    assert out.shape == ref.shape == (4 * 4 * 2, 1), (out.shape, ref.shape)
    # Tolerance reflects the bf16 MXU inputs / bf16 inter-layer activations
    # (accumulation and BN statistics are f32); reference is pure f32.
    np.testing.assert_allclose(np.asarray(out), np.asarray(ref),
                               rtol=3e-2, atol=3e-2)
    print("KERNEL_OK")
</pallas_src>

<mosaic_0001>
module attributes {stable_mosaic.version = 11 : i64} {
  func.func @_fused_conv_kernel(%arg0: i32, %arg1: memref<64x128xbf16, #tpu.memory_space<vmem>>, %arg2: memref<128x128xbf16, #tpu.memory_space<vmem>>, %arg3: memref<1x128xf32, #tpu.memory_space<vmem>>, %arg4: memref<1x128xf32, #tpu.memory_space<vmem>>, %arg5: memref<64x128xbf16, #tpu.memory_space<vmem>>, %arg6: memref<1x2x128xf32, #tpu.memory_space<vmem>>) attributes {dimension_semantics = [#tpu.dimension_semantics<parallel>], iteration_bounds = array<i64: 2>, scalar_prefetch = 0 : i64, scratch_operands = 0 : i64, tpu.core_type = #tpu.core_type<tc>, window_params = [{transform_indices = @transform_0, window_bounds = array<i64: 64, 128>}, {pipeline_mode = #tpu.pipeline_mode<synchronous>, transform_indices = @transform_1, window_bounds = array<i64: 128, 128>}, {pipeline_mode = #tpu.pipeline_mode<synchronous>, transform_indices = @transform_2, window_bounds = array<i64: 1, 128>}, {pipeline_mode = #tpu.pipeline_mode<synchronous>, transform_indices = @transform_3, window_bounds = array<i64: 1, 128>}, {transform_indices = @transform_4, window_bounds = array<i64: 64, 128>}, {transform_indices = @transform_5, window_bounds = array<i64: 1, 2, 128>}]} {
    %c0 = arith.constant 0 : index
    %c0_0 = arith.constant 0 : index
    %0 = vector.load %arg1[%c0, %c0_0] : memref<64x128xbf16, #tpu.memory_space<vmem>>, vector<64x128xbf16>
    %c0_1 = arith.constant 0 : index
    %c0_2 = arith.constant 0 : index
    %1 = vector.load %arg2[%c0_1, %c0_2] : memref<128x128xbf16, #tpu.memory_space<vmem>>, vector<128x128xbf16>
    %cst = arith.constant dense<0.000000e+00> : vector<64x128xf32>
    %2 = tpu.matmul %0, %1, %cst {dimension_numbers = #tpu.dot_dimension_numbers<[1], [0], [0], [1], [0, 0, 1, 1], [], []>} : vector<64x128xbf16>, vector<128x128xbf16>, vector<64x128xf32> -> vector<64x128xf32>
    %3 = arith.truncf %2 : vector<64x128xf32> to vector<64x128xbf16>
    %c0_3 = arith.constant 0 : index
    %c0_4 = arith.constant 0 : index
    %4 = vector.load %arg5[%c0_3, %c0_4] : memref<64x128xbf16, #tpu.memory_space<vmem>>, vector<64x128xbf16>
    tpu.vector_store %arg5[%c0_3, %c0_4], %3 {strides = array<i32>} : memref<64x128xbf16, #tpu.memory_space<vmem>>, vector<64x128xbf16>,
    %cst_5 = arith.constant dense<0.000000e+00> : vector<128xf32>
    %5 = vector.multi_reduction <add>, %2, %cst_5 [0] : vector<64x128xf32> to vector<128xf32>
    %6 = vector.shape_cast %5 : vector<128xf32> to vector<1x128xf32>
    %7 = arith.mulf %2, %2 : vector<64x128xf32>
    %cst_6 = arith.constant dense<0.000000e+00> : vector<128xf32>
    %8 = vector.multi_reduction <add>, %7, %cst_6 [0] : vector<64x128xf32> to vector<128xf32>
    %9 = vector.shape_cast %8 : vector<128xf32> to vector<1x128xf32>
    %10 = tpu.concatenate %6, %9 in 0 : vector<1x128xf32>, vector<1x128xf32> -> vector<2x128xf32>
    %11 = vector.shape_cast %10 : vector<2x128xf32> to vector<1x2x128xf32>
    %c0_7 = arith.constant 0 : index
    %c0_8 = arith.constant 0 : index
    %c0_9 = arith.constant 0 : index
    %12 = vector.load %arg6[%c0_7, %c0_8, %c0_9] : memref<1x2x128xf32, #tpu.memory_space<vmem>>, vector<1x2x128xf32>
    tpu.vector_store %arg6[%c0_7, %c0_8, %c0_9], %11 {strides = array<i32>} : memref<1x2x128xf32, #tpu.memory_space<vmem>>, vector<1x2x128xf32>,
    return
  }
  func.func @transform_0(%arg0: i32) -> (i32, i32) {
    %c0_i32 = arith.constant 0 : i32
    %c0_i32_0 = arith.constant 0 : i32
    return %arg0, %c0_i32 : i32, i32
  }
  func.func @transform_1(%arg0: i32) -> (i32, i32) {
    %c0_i32 = arith.constant 0 : i32
    %c0_i32_0 = arith.constant 0 : i32
    %c0_i32_1 = arith.constant 0 : i32
    return %c0_i32, %c0_i32_0 : i32, i32
  }
  func.func @transform_2(%arg0: i32) -> (i32, i32) {
    %c0_i32 = arith.constant 0 : i32
    %c0_i32_0 = arith.constant 0 : i32
    %c0_i32_1 = arith.constant 0 : i32
    return %c0_i32, %c0_i32_0 : i32, i32
  }
  func.func @transform_3(%arg0: i32) -> (i32, i32) {
    %c0_i32 = arith.constant 0 : i32
    %c0_i32_0 = arith.constant 0 : i32
    %c0_i32_1 = arith.constant 0 : i32
    return %c0_i32, %c0_i32_0 : i32, i32
  }
  func.func @transform_4(%arg0: i32) -> (i32, i32) {
    %c0_i32 = arith.constant 0 : i32
    %c0_i32_0 = arith.constant 0 : i32
    return %arg0, %c0_i32 : i32, i32
  }
  func.func @transform_5(%arg0: i32) -> (i32, i32, i32) {
    %c0_i32 = arith.constant 0 : i32
    %c0_i32_0 = arith.constant 0 : i32
    %c0_i32_1 = arith.constant 0 : i32
    return %arg0, %c0_i32, %c0_i32_0 : i32, i32, i32
  }
}

module attributes {stable_mosaic.version = 11 : i64} {
  func.func @_bn_relu_predict_kernel(%arg0: i32, %arg1: memref<16x128xbf16, #tpu.memory_space<vmem>>, %arg2: memref<1x128xf32, #tpu.memory_space<vmem>>, %arg3: memref<1x128xf32, #tpu.memory_space<vmem>>, %arg4: memref<1x128xf32, #tpu.memory_space<vmem>>, %arg5: memref<16x1xf32, #tpu.memory_space<vmem>>) attributes {dimension_semantics = [#tpu.dimension_semantics<parallel>], iteration_bounds = array<i64: 2>, scalar_prefetch = 0 : i64, scratch_operands = 0 : i64, tpu.core_type = #tpu.core_type<tc>, window_params = [{transform_indices = @transform_0, window_bounds = array<i64: 16, 128>}, {pipeline_mode = #tpu.pipeline_mode<synchronous>, transform_indices = @transform_1, window_bounds = array<i64: 1, 128>}, {pipeline_mode = #tpu.pipeline_mode<synchronous>, transform_indices = @transform_2, window_bounds = array<i64: 1, 128>}, {pipeline_mode = #tpu.pipeline_mode<synchronous>, transform_indices = @transform_3, window_bounds = array<i64: 1, 128>}, {transform_indices = @transform_4, window_bounds = array<i64: 16, 1>}]} {
    %c0 = arith.constant 0 : index
    %c0_0 = arith.constant 0 : index
    %0 = vector.load %arg1[%c0, %c0_0] : memref<16x128xbf16, #tpu.memory_space<vmem>>, vector<16x128xbf16>
    %1 = arith.extf %0 : vector<16x128xbf16> to vector<16x128xf32>
    %c0_1 = arith.constant 0 : index
    %c0_2 = arith.constant 0 : index
    %2 = vector.load %arg2[%c0_1, %c0_2] : memref<1x128xf32, #tpu.memory_space<vmem>>, vector<1x128xf32>
    %3 = vector.broadcast %2 : vector<1x128xf32> to vector<16x128xf32>
    %4 = arith.mulf %1, %3 : vector<16x128xf32>
    %c0_3 = arith.constant 0 : index
    %c0_4 = arith.constant 0 : index
    %5 = vector.load %arg3[%c0_3, %c0_4] : memref<1x128xf32, #tpu.memory_space<vmem>>, vector<1x128xf32>
    %6 = vector.broadcast %5 : vector<1x128xf32> to vector<16x128xf32>
    %7 = arith.addf %4, %6 : vector<16x128xf32>
    %cst = arith.constant 0.000000e+00 : f32
    %8 = vector.broadcast %cst : f32 to vector<16x128xf32>
    %9 = arith.maximumf %7, %8 : vector<16x128xf32>
    %c0_5 = arith.constant 0 : index
    %c0_6 = arith.constant 0 : index
    %10 = vector.load %arg4[%c0_5, %c0_6] : memref<1x128xf32, #tpu.memory_space<vmem>>, vector<1x128xf32>
    %11 = vector.broadcast %10 : vector<1x128xf32> to vector<16x128xf32>
    %12 = arith.mulf %9, %11 : vector<16x128xf32>
    %cst_7 = arith.constant dense<0.000000e+00> : vector<16xf32>
    %13 = vector.multi_reduction <add>, %12, %cst_7 [1] : vector<16x128xf32> to vector<16xf32>
    %14 = vector.shape_cast %13 : vector<16xf32> to vector<16x1xf32>
    %c0_8 = arith.constant 0 : index
    %c0_9 = arith.constant 0 : index
    %15 = vector.load %arg5[%c0_8, %c0_9] : memref<16x1xf32, #tpu.memory_space<vmem>>, vector<16x1xf32>
    tpu.vector_store %arg5[%c0_8, %c0_9], %14 {strides = array<i32>} : memref<16x1xf32, #tpu.memory_space<vmem>>, vector<16x1xf32>,
    return
  }
  func.func @transform_0(%arg0: i32) -> (i32, i32) {
    %c0_i32 = arith.constant 0 : i32
    %c0_i32_0 = arith.constant 0 : i32
    return %arg0, %c0_i32 : i32, i32
  }
  func.func @transform_1(%arg0: i32) -> (i32, i32) {
    %c0_i32 = arith.constant 0 : i32
    %c0_i32_0 = arith.constant 0 : i32
    %c0_i32_1 = arith.constant 0 : i32
    return %c0_i32, %c0_i32_0 : i32, i32
  }
  func.func @transform_2(%arg0: i32) -> (i32, i32) {
    %c0_i32 = arith.constant 0 : i32
    %c0_i32_0 = arith.constant 0 : i32
    %c0_i32_1 = arith.constant 0 : i32
    return %c0_i32, %c0_i32_0 : i32, i32
  }
  func.func @transform_3(%arg0: i32) -> (i32, i32) {
    %c0_i32 = arith.constant 0 : i32
    %c0_i32_0 = arith.constant 0 : i32
    %c0_i32_1 = arith.constant 0 : i32
    return %c0_i32, %c0_i32_0 : i32, i32
  }
  func.func @transform_4(%arg0: i32) -> (i32, i32) {
    %c0_i32 = arith.constant 0 : i32
    %c0_i32_0 = arith.constant 0 : i32
    return %arg0, %c0_i32 : i32, i32
  }
}

module attributes {stable_mosaic.version = 11 : i64} {
  func.func @_fused_conv_kernel(%arg0: i32, %arg1: memref<16x512xbf16, #tpu.memory_space<vmem>>, %arg2: memref<512x128xbf16, #tpu.memory_space<vmem>>, %arg3: memref<1x512xf32, #tpu.memory_space<vmem>>, %arg4: memref<1x512xf32, #tpu.memory_space<vmem>>, %arg5: memref<16x128xbf16, #tpu.memory_space<vmem>>, %arg6: memref<1x2x128xf32, #tpu.memory_space<vmem>>) attributes {dimension_semantics = [#tpu.dimension_semantics<parallel>], iteration_bounds = array<i64: 2>, scalar_prefetch = 0 : i64, scratch_operands = 0 : i64, tpu.core_type = #tpu.core_type<tc>, window_params = [{transform_indices = @transform_0, window_bounds = array<i64: 16, 512>}, {pipeline_mode = #tpu.pipeline_mode<synchronous>, transform_indices = @transform_1, window_bounds = array<i64: 512, 128>}, {pipeline_mode = #tpu.pipeline_mode<synchronous>, transform_indices = @transform_2, window_bounds = array<i64: 1, 512>}, {pipeline_mode = #tpu.pipeline_mode<synchronous>, transform_indices = @transform_3, window_bounds = array<i64: 1, 512>}, {transform_indices = @transform_4, window_bounds = array<i64: 16, 128>}, {transform_indices = @transform_5, window_bounds = array<i64: 1, 2, 128>}]} {
    %c0 = arith.constant 0 : index
    %c0_0 = arith.constant 0 : index
    %0 = vector.load %arg1[%c0, %c0_0] : memref<16x512xbf16, #tpu.memory_space<vmem>>, vector<16x512xbf16>
    %1 = arith.extf %0 : vector<16x512xbf16> to vector<16x512xf32>
    %c0_1 = arith.constant 0 : index
    %c0_2 = arith.constant 0 : index
    %2 = vector.load %arg3[%c0_1, %c0_2] : memref<1x512xf32, #tpu.memory_space<vmem>>, vector<1x512xf32>
    %3 = vector.broadcast %2 : vector<1x512xf32> to vector<16x512xf32>
    %4 = arith.mulf %1, %3 : vector<16x512xf32>
    %c0_3 = arith.constant 0 : index
    %c0_4 = arith.constant 0 : index
    %5 = vector.load %arg4[%c0_3, %c0_4] : memref<1x512xf32, #tpu.memory_space<vmem>>, vector<1x512xf32>
    %6 = vector.broadcast %5 : vector<1x512xf32> to vector<16x512xf32>
    %7 = arith.addf %4, %6 : vector<16x512xf32>
    %cst = arith.constant 0.000000e+00 : f32
    %8 = vector.broadcast %cst : f32 to vector<16x512xf32>
    %9 = arith.maximumf %7, %8 : vector<16x512xf32>
    %10 = arith.truncf %9 : vector<16x512xf32> to vector<16x512xbf16>
    %c0_5 = arith.constant 0 : index
    %c0_6 = arith.constant 0 : index
    %11 = vector.load %arg2[%c0_5, %c0_6] : memref<512x128xbf16, #tpu.memory_space<vmem>>, vector<512x128xbf16>
    %cst_7 = arith.constant dense<0.000000e+00> : vector<16x128xf32>
    %12 = tpu.matmul %10, %11, %cst_7 {dimension_numbers = #tpu.dot_dimension_numbers<[1], [0], [0], [1], [0, 0, 1, 1], [], []>} : vector<16x512xbf16>, vector<512x128xbf16>, vector<16x128xf32> -> vector<16x128xf32>
    %13 = arith.truncf %12 : vector<16x128xf32> to vector<16x128xbf16>
    %c0_8 = arith.constant 0 : index
    %c0_9 = arith.constant 0 : index
    %14 = vector.load %arg5[%c0_8, %c0_9] : memref<16x128xbf16, #tpu.memory_space<vmem>>, vector<16x128xbf16>
    tpu.vector_store %arg5[%c0_8, %c0_9], %13 {strides = array<i32>} : memref<16x128xbf16, #tpu.memory_space<vmem>>, vector<16x128xbf16>,
    %cst_10 = arith.constant dense<0.000000e+00> : vector<128xf32>
    %15 = vector.multi_reduction <add>, %12, %cst_10 [0] : vector<16x128xf32> to vector<128xf32>
    %16 = vector.shape_cast %15 : vector<128xf32> to vector<1x128xf32>
    %17 = arith.mulf %12, %12 : vector<16x128xf32>
    %cst_11 = arith.constant dense<0.000000e+00> : vector<128xf32>
    %18 = vector.multi_reduction <add>, %17, %cst_11 [0] : vector<16x128xf32> to vector<128xf32>
    %19 = vector.shape_cast %18 : vector<128xf32> to vector<1x128xf32>
    %20 = tpu.concatenate %16, %19 in 0 : vector<1x128xf32>, vector<1x128xf32> -> vector<2x128xf32>
    %21 = vector.shape_cast %20 : vector<2x128xf32> to vector<1x2x128xf32>
    %c0_12 = arith.constant 0 : index
    %c0_13 = arith.constant 0 : index
    %c0_14 = arith.constant 0 : index
    %22 = vector.load %arg6[%c0_12, %c0_13, %c0_14] : memref<1x2x128xf32, #tpu.memory_space<vmem>>, vector<1x2x128xf32>
    tpu.vector_store %arg6[%c0_12, %c0_13, %c0_14], %21 {strides = array<i32>} : memref<1x2x128xf32, #tpu.memory_space<vmem>>, vector<1x2x128xf32>,
    return
  }
  func.func @transform_0(%arg0: i32) -> (i32, i32) {
    %c0_i32 = arith.constant 0 : i32
    %c0_i32_0 = arith.constant 0 : i32
    return %arg0, %c0_i32 : i32, i32
  }
  func.func @transform_1(%arg0: i32) -> (i32, i32) {
    %c0_i32 = arith.constant 0 : i32
    %c0_i32_0 = arith.constant 0 : i32
    %c0_i32_1 = arith.constant 0 : i32
    return %c0_i32, %c0_i32_0 : i32, i32
  }
  func.func @transform_2(%arg0: i32) -> (i32, i32) {
    %c0_i32 = arith.constant 0 : i32
    %c0_i32_0 = arith.constant 0 : i32
    %c0_i32_1 = arith.constant 0 : i32
    return %c0_i32, %c0_i32_0 : i32, i32
  }
  func.func @transform_3(%arg0: i32) -> (i32, i32) {
    %c0_i32 = arith.constant 0 : i32
    %c0_i32_0 = arith.constant 0 : i32
    %c0_i32_1 = arith.constant 0 : i32
    return %c0_i32, %c0_i32_0 : i32, i32
  }
  func.func @transform_4(%arg0: i32) -> (i32, i32) {
    %c0_i32 = arith.constant 0 : i32
    %c0_i32_0 = arith.constant 0 : i32
    return %arg0, %c0_i32 : i32, i32
  }
  func.func @transform_5(%arg0: i32) -> (i32, i32, i32) {
    %c0_i32 = arith.constant 0 : i32
    %c0_i32_0 = arith.constant 0 : i32
    %c0_i32_1 = arith.constant 0 : i32
    return %arg0, %c0_i32, %c0_i32_0 : i32, i32, i32
  }
}

</mosaic_0001>

<bundles_post_ra>
// kernel: dcgan_patch_discriminator.3
= control target key start
LH: loop header
LB: loop body
LE: loop exit
PB: predicated region body
PF: predicated region fallthrough
CT: control target
= control target key end

     0   :  { %s738_s18 = smov 0   ;;  %s800_s0 = inlined_call_operand.vmem [shape: bf16[128,128], index: 0, kind: input, shape index: {}]   ;;  %s801_s1 = inlined_call_operand.vmem [shape: bf16[128,128], index: 1, kind: input, shape index: {}]   ;;  %s802_s2 = inlined_call_operand.vmem [shape: f32[1,128], index: 2, kind: input, shape index: {}]   ;;  %s803_s3 = inlined_call_operand.vmem [shape: f32[1,128], index: 3, kind: input, shape index: {}]   ;;  %s804_s4 = inlined_call_operand.vmem [shape: bf16[128,128], index: 4, kind: output, shape index: {0}]   ;;  %s805_s5 = inlined_call_operand.vmem [shape: f32[2,2,128], index: 5, kind: output, shape index: {1}]  }
   0x1 LB: > { %s744_s2 = sadd.s32 4294967295, %s706_s18   ;;  %p569_p0 = scmp.ge.s32.totalorder %s706_s18, 1  ;;  %s706_s18 = sphi %s738_s18, %s16_s18  }
   0x2   : > { %p191_p1 = scmp.lt.s32.totalorder %s706_s18, 3 }
   0x4   : > { %p192_p2 = pnand %p569_p0, %p191_p1 }
   0x5   : > { %s570_s20 = sshll.u32 (!%p192_p2), %s744_s2, 3  ;;  %p235_p4 = scmp.lt.s32.totalorder (!%p192_p2), %s744_s2, 1 }
   0x6   : > { %195 = sbr.rel (%p192_p2) target bundleno = 273 (0x111), region = 36  ;;  %p224_p3 = scmp.lt.s32.totalorder (!%p192_p2), %s570_s20, 15 }
   0xb   : > { %v688_v0 = vld [vmem:[%s801_s1 + $0x38] sm:$0xff]   ;;  %v689_v1 = vld [vmem:[%s801_s1 + $0x30] sm:$0xff]   ;;  %s807_s20 = smov (!%p224_p3, %s570_s20), 15  ;;  %v690_v2 = vld [vmem:[%s801_s1 + $0x28] sm:$0xff]   ;;  %s809_s2 = smov (!%p235_p4, %s744_s2), 1  ;;  %vm475_vm0 = vcmask 1040384  }
   0xc   : > { %640 = vmatprep.subr.bf16.mxu0 %v688_v0  ;;  %664 = vmatprep.subr.bf16.mxu1 %v688_v0  ;;  %s571_s25 = sshll.u32 %s807_s20, 2  ;;  %v691_v3 = vld [vmem:[%s801_s1 + $0x20] sm:$0xff]   ;;  %v692_v6 = vld [vmem:[%s801_s1 + $0x18] sm:$0xff]   ;;  %v693_v7 = vld [vmem:[%s801_s1 + $0x10] sm:$0xff]   ;;  %s574_s17 = sshll.u32 %s809_s2, 1 }
   0xd   : > { %641 = vmatpush3.bf16.msra.mxu0 %v688_v0  ;;  %672 = vmatpush3.bf16.msra.mxu1 %v688_v0  ;;  %s766_s28 = scalar_lea.vmem %s800_s0, %s571_s25  ;;  %v694_v8 = vld [vmem:[%s801_s1 + $0x8] sm:$0xff]   ;;  %v695_v9 = vld [vmem:[%s801_s1] sm:$0xff]   ;;  %s233_s16 = scalar_lea.vmem %s804_s4, %s571_s25 }
   0xe   : > { %642 = vmatprep.subr.bf16.mxu0 %v689_v1  ;;  %665 = vmatprep.subr.bf16.mxu1 %v689_v1  ;;  %v696_v4 = vld [vmem:[%s766_s28] sm:$0xff]   ;;  %v698_v5 = vld [vmem:[%s766_s28 + $0x10] sm:$0xff]   ;;  %v697_v10 = vld [vmem:[%s766_s28 + $0x8] sm:$0xff]   ;;  %s238_s20 = scalar_lea.vmem %s805_s5, %s574_s17 }
   0xf   : > { %656 = vmatprep.mubr.bf16.mxu0 %v696_v4  ;;  %660 = vmatprep.mubr.bf16.mxu1 %v698_v5  ;;  %v699_v11 = vld [vmem:[%s766_s28 + $0x18] sm:$0xff]  }
  0x11   : > { %643 = vmatpush3.bf16.msra.mxu0 %v689_v1  ;;  %673 = vmatpush3.bf16.msra.mxu1 %v689_v1 }
  0x12   : > { %644 = vmatprep.subr.bf16.mxu0 %v690_v2  ;;  %666 = vmatprep.subr.bf16.mxu1 %v690_v2 }
  0x15   : > { %645 = vmatpush3.bf16.msra.mxu0 %v690_v2  ;;  %674 = vmatpush3.bf16.msra.mxu1 %v690_v2 }
  0x16   : > { %646 = vmatprep.subr.bf16.mxu0 %v691_v3  ;;  %667 = vmatprep.subr.bf16.mxu1 %v691_v3 }
  0x19   : > { %647 = vmatpush3.bf16.msra.mxu0 %v691_v3  ;;  %675 = vmatpush3.bf16.msra.mxu1 %v691_v3 }
  0x1a   : > { %648 = vmatprep.subr.bf16.mxu0 %v692_v6  ;;  %668 = vmatprep.subr.bf16.mxu1 %v692_v6 }
  0x1d   : > { %649 = vmatpush3.bf16.msra.mxu0 %v692_v6  ;;  %676 = vmatpush3.bf16.msra.mxu1 %v692_v6 }
  0x1e   : > { %650 = vmatprep.subr.bf16.mxu0 %v693_v7  ;;  %669 = vmatprep.subr.bf16.mxu1 %v693_v7 }
  0x21   : > { %651 = vmatpush3.bf16.msra.mxu0 %v693_v7  ;;  %677 = vmatpush3.bf16.msra.mxu1 %v693_v7 }
  0x22   : > { %652 = vmatprep.subr.bf16.mxu0 %v694_v8  ;;  %670 = vmatprep.subr.bf16.mxu1 %v694_v8 }
  0x25   : > { %653 = vmatpush3.bf16.msra.mxu0 %v694_v8  ;;  %678 = vmatpush3.bf16.msra.mxu1 %v694_v8 }
  0x26   : > { %654 = vmatprep.subr.bf16.mxu0 %v695_v9  ;;  %671 = vmatprep.subr.bf16.mxu1 %v695_v9 }
  0x29   : > { %655 = vmatpush3.bf16.msra.mxu0 %v695_v9  ;;  %679 = vmatpush3.bf16.msra.mxu1 %v695_v9 }
  0x2c   : > { %657 = vmatmul.mubr.bf16.vlgmr.msra.gmra.mxu0 %v697_v10  ;;  %661 = vmatmul.mubr.bf16.vlgmr.msra.gmra.mxu1 %v699_v11 }
  0xec   : > { %v658_v12 = vpop.f32.mrf.mxu0  ;;  %v662_v13 = vpop.f32.mrf.mxu1 }
  0xed   : > { %v456_v27 = vmul.f32 %v658_v12, %v658_v12  ;;  %v460_v39 = vmul.f32 %v662_v13, %v662_v13 }
  0xee   : > { %v370_v14 = vpop.f32.mrf.mxu0  ;;  %v386_v15 = vpop.f32.mrf.mxu1 }
  0xef   : > { %v454_v20 = vmul.f32 %v370_v14, %v370_v14  ;;  %v458_v33 = vmul.f32 %v386_v15, %v386_v15 }
  0xf0   : > { %v659_v16 = vpop.f32.mrf.mxu0  ;;  %v663_v17 = vpop.f32.mrf.mxu1 }
  0xf1   : > { %v613_v18 = vpack.c.bf16 %v659_v16, %v658_v12  ;;  %v623_v19 = vpack.c.bf16 %v663_v17, %v662_v13  ;;  %v457_v30 = vmul.f32 %v659_v16, %v659_v16  ;;  %v461_v42 = vmul.f32 %v663_v17, %v663_v17 }
  0xf2   : > { %v373_v21 = vpop.f32.mrf.mxu0  ;;  %v389_v22 = vpop.f32.mrf.mxu1 }
  0xf3   : > { %625 = vst [vmem:[%s233_s16 + $0x8] sm:$0xff] %v613_v18   ;;  %v608_v23 = vpack.c.bf16 %v373_v21, %v370_v14  ;;  %v441_v24 = vadd.f32 %v373_v21, %v370_v14  ;;  %v455_v25 = vmul.f32 %v373_v21, %v373_v21  ;;  %627 = vst [vmem:[%s233_s16 + $0x18] sm:$0xff] %v623_v19  }
  0xf4   : > { %v618_v26 = vpack.c.bf16 %v389_v22, %v386_v15  ;;  %v459_v37 = vmul.f32 %v389_v22, %v389_v22 }
  0xf5   : > { %609 = vst [vmem:[%s233_s16] sm:$0xff] %v608_v23   ;;  %v442_v28 = vadd.f32 %v658_v12, %v441_v24  ;;  %v462_v29 = vadd.f32 %v455_v25, %v454_v20 }
  0xf6   : > { %626 = vst [vmem:[%s233_s16 + $0x10] sm:$0xff] %v618_v26  }
  0xf7   : > { %v463_v31 = vadd.f32 %v462_v29, %v456_v27  ;;  %v443_v32 = vadd.f32 %v659_v16, %v442_v28 }
  0xf9   : > { %v444_v34 = vadd.f32 %v443_v32, %v386_v15  ;;  %v464_v35 = vadd.f32 %v463_v31, %v457_v30 }
  0xfb   : > { %v445_v36 = vadd.f32 %v444_v34, %v389_v22  ;;  %v465_v38 = vadd.f32 %v464_v35, %v458_v33 }
  0xfd   : > { %v446_v40 = vadd.f32 %v662_v13, %v445_v36  ;;  %v466_v41 = vadd.f32 %v465_v38, %v459_v37 }
  0xff   : > { %v447_v43 = vadd.f32 %v663_v17, %v446_v40  ;;  %v467_v44 = vadd.f32 %v466_v41, %v460_v39 }
 0x101   : > { %v448_v45 = vrot.slane %v447_v43, 4  ;;  %v468_v46 = vadd.f32 %v467_v44, %v461_v42 }
 0x103   : > { %v449_v47 = vadd.f32 %v448_v45, %v447_v43  ;;  %v469_v48 = vrot.slane %v468_v46, 4 }
 0x105   : > { %v450_v49 = vrot.slane %v449_v47, 2  ;;  %v470_v50 = vadd.f32 %v469_v48, %v468_v46 }
 0x107   : > { %v451_v51 = vadd.f32 %v450_v49, %v449_v47  ;;  %v471_v52 = vrot.slane %v470_v50, 2 }
 0x109   : > { %v452_v53 = vrot.slane %v451_v51, 1  ;;  %v472_v54 = vadd.f32 %v471_v52, %v470_v50 }
 0x10b   : > { %v473_v55 = vrot.slane %v472_v54, 1  ;;  %v453_v56 = vadd.f32 %v452_v53, %v451_v51 }
 0x10d   : > { %v474_v57 = vadd.f32 %v473_v55, %v472_v54 }
 0x10f   : > { %v476_v58 = vsel %vm475_vm0, %v453_v56, %v474_v57 }
 0x110   : > { %477 = vst [vmem:[%s238_s20] sm:$0x3] %v476_v58 }
 0x111 PF: > { %s16_s18 = sadd.s32 1, %s706_s18  }
 0x112   : > { %p13_p5 = scmp.ge.s32.totalorder %s16_s18, 4  }
 0x114   :  { %15 = sbr.rel (!%p13_p5) target bundleno = 1 (0x1), region = 78 }

// kernel: tile.13
= control target key start
LH: loop header
LB: loop body
LE: loop exit
PB: predicated region body
PF: predicated region fallthrough
CT: control target
= control target key end

     0   :  { %s40_s0 = inlined_call_operand.vmem [shape: f32[16], index: 0, kind: input, shape index: {}]   ;;  %s41_s1 = inlined_call_operand.vmem [shape: f32[25,16], index: 1, kind: output, shape index: {}]  }
   0x1   :  { %v4_v0 = vld [vmem:[%s40_s0] ss:$0 sm:$0xff] }
   0x2   :  { %5 = vst [vmem:[%s41_s1] sm:$0xff] %v4_v0  ;;  %12 = vst [vmem:[%s41_s1 + $0x8] sm:$0xff] %v4_v0 }
   0x3   :  { %13 = vst [vmem:[%s41_s1 + $0x10] sm:$0xff] %v4_v0  ;;  %14 = vst [vmem:[%s41_s1 + $0x18] sm:$0xff] %v4_v0 }

// kernel: tile.14
= control target key start
LH: loop header
LB: loop body
LE: loop exit
PB: predicated region body
PF: predicated region fallthrough
CT: control target
= control target key end

     0   :  { %s69_s8 = smov 112   ;;  %s70_s11 = smov 80   ;;  %vm3_vm0 = vcmask 130048   ;;  %vm9_vm1 = vcmask 1048448   ;;  %vm15_vm2 = vcmask 917248   ;;  %vm21_vm3 = vcmask 786048   ;;  %s113_s0 = inlined_call_operand.vmem [shape: f32[25,16], index: 0, kind: input, shape index: {}]   ;;  %s114_s1 = inlined_call_operand.vmem [shape: f32[400], index: 1, kind: output, shape index: {}]  }
   0x1   :  { %v55_v0 = vld [vmem:[%s113_s0 + $0x7] ss:$8 sm:$0x7]   ;;  %v57_v1 = vld [vmem:[%s113_s0 + $0x5] ss:$8 sm:$0x7]  }
   0x2   :  { %7 = vrot.lane.b32.xlu0 %v55_v0, %s69_s8  ;;  %19 = vrot.lane.b32.xlu1 %v57_v1, %s70_s11  ;;  %v56_v2 = vld [vmem:[%s113_s0 + $0x6] ss:$8 sm:$0x7]   ;;  %v58_v3 = vld [vmem:[%s113_s0 + $0x4] ss:$8 sm:$0x7]  }
   0x3   :  { %s71_s16 = smov 96   ;;  %v2_v4 = vld [vmem:[%s113_s0] ss:$8 sm:$0xf]   ;;  %s72_s19 = smov 64   ;;  %vm27_vm4 = vcmask 654848  }
   0x4   :  { %v59_v5 = vld [vmem:[%s113_s0 + $0x3] ss:$8 sm:$0x7]   ;;  %4 = vst.msk [vmem:[#allocation0] sm:$0xf] %vm3_vm0, %v2_v4   ;;  %s73_s24 = smov 48  }
   0x5   :  { %v60_v6 = vld [vmem:[%s113_s0 + $0x2] ss:$8 sm:$0x7]   ;;  %s74_s25 = smov 32   ;;  %vm33_vm5 = vcmask 523648   ;;  %vm39_vm6 = vcmask 392448  }
   0x6   :  { %13 = vrot.lane.b32.xlu0 %v56_v2, %s71_s16  ;;  %25 = vrot.lane.b32.xlu1 %v58_v3, %s72_s19  ;;  %v61_v7 = vld [vmem:[%s113_s0 + $0x1] ss:$8 sm:$0x7]   ;;  %s75_s0 = smov 16   ;;  %vm45_vm7 = vcmask 261248  }
   0xa   :  { %31 = vrot.lane.b32.xlu0 %v59_v5, %s73_s24  ;;  %37 = vrot.lane.b32.xlu1 %v60_v6, %s74_s25 }
   0xe   :  { %43 = vrot.lane.b32.xlu0 %v61_v7, %s75_s0 }
  0x74   :  { %v8_v8 = vpop.permute.xlu0 %7   ;;  %v20_v9 = vpop.permute.xlu1 %19  }
  0x75   :  { %10 = vst.msk [vmem:[#allocation0] sm:$0x7] %vm9_vm1, %v8_v8  }
  0x78   :  { %v14_v10 = vpop.permute.xlu0 %13   ;;  %v26_v11 = vpop.permute.xlu1 %25  }
  0x79   :  { %16 = vst.msk [vmem:[#allocation0] sm:$0x7] %vm15_vm2, %v14_v10  }
  0x7a   :  { %22 = vst.msk [vmem:[#allocation0] sm:$0x7] %vm21_vm3, %v20_v9  }
  0x7b   :  { %28 = vst.msk [vmem:[#allocation0] sm:$0x7] %vm27_vm4, %v26_v11  }
  0x7c   :  { %v32_v12 = vpop.permute.xlu0 %31   ;;  %v38_v13 = vpop.permute.xlu1 %37  }
  0x7d   :  { %34 = vst.msk [vmem:[#allocation0] sm:$0x7] %vm33_vm5, %v32_v12  }
  0x7e   :  { %40 = vst.msk [vmem:[#allocation0] sm:$0x7] %vm39_vm6, %v38_v13  }
  0x80   :  { %v44_v14 = vpop.permute.xlu0 %43  }
  0x81   :  { %46 = vst.msk [vmem:[#allocation0] sm:$0x7] %vm45_vm7, %v44_v14  }
  0x88   :  { %v51_v15 = vld [vmem:[#allocation0] sm:$0xf] }
  0x89   :  { %54 = vst [vmem:[%s114_s1] sm:$0xf] %v51_v15 }

// kernel: dcgan_patch_discriminator.5
= control target key start
LH: loop header
LB: loop body
LE: loop exit
PB: predicated region body
PF: predicated region fallthrough
CT: control target
= control target key end

     0   :  { %s356_s15 = smov 0   ;;  %s382_s0 = inlined_call_operand.vmem [shape: bf16[32,128], index: 0, kind: input, shape index: {}]   ;;  %s383_s1 = inlined_call_operand.vmem [shape: f32[1,128], index: 1, kind: input, shape index: {}]   ;;  %s384_s2 = inlined_call_operand.vmem [shape: f32[1,128], index: 2, kind: input, shape index: {}]   ;;  %s385_s3 = inlined_call_operand.vmem [shape: f32[1,128], index: 3, kind: input, shape index: {}]   ;;  %s386_s4 = inlined_call_operand.vmem [shape: f32[32,1], index: 4, kind: output, shape index: {}]  }
   0x1 LB: > { %s297_s16 = sadd.s32 4294967295, %s329_s15   ;;  %p301_p0 = scmp.ge.s32.totalorder %s329_s15, 1  ;;  %s329_s15 = sphi %s356_s15, %s14_s15  }
   0x2   : > { %p163_p1 = scmp.lt.s32.totalorder %s329_s15, 3 }
   0x4   : > { %p164_p2 = pnand %p301_p0, %p163_p1 }
   0x5   : > { %s302_s17 = sshll.u32 (!%p164_p2), %s297_s16, 1 }
   0x6   : > { %167 = sbr.rel (%p164_p2) target bundleno = 168 (0xa8), region = 36  ;;  %p190_p3 = scmp.lt.s32.totalorder (!%p164_p2), %s302_s17, 3 }
   0xb   : > { %s388_s17 = smov (!%p190_p3, %s302_s17), 3  ;;  %v306_v1 = vld [vmem:[%s383_s1] ss:$0 sm:$0xff]  ;;  %vm238_vm0 = vcmask 7168  }
   0xc   : > { %s303_s18 = sshll.u32 %s388_s17, 2  ;;  %v307_v4 = vld [vmem:[%s384_s2] ss:$0 sm:$0xff]  ;;  %s305_s28 = sshll.u32 %s388_s17, 3 }
   0xd   : > { %s193_s21 = scalar_lea.vmem %s382_s0, %s303_s18  ;;  %v308_v9 = vld [vmem:[%s385_s3] ss:$0 sm:$0xff]  ;;  %s199_s5 = scalar_lea.vmem %s386_s4, %s305_s28 }
   0xe   : > { %v312_v0 = vld [vmem:[%s193_s21] sm:$0xff]  }
   0xf   : > { %v313_v2 = vunpack.c.l.bf16 %v312_v0  ;;  %v314_v3 = vunpack.c.h.bf16 %v312_v0 }
  0x11   : > { %v212_v5 = vmul.f32 %v313_v2, %v306_v1  ;;  %v213_v6 = vmul.f32 %v314_v3, %v306_v1 }
  0x13   : > { %v221_v7 = vadd.f32 %v307_v4, %v212_v5  ;;  %v222_v8 = vadd.f32 %v307_v4, %v213_v6 }
  0x15   : > { %v223_v10 = vmax.f32 %v221_v7, 0.0  ;;  %v224_v11 = vmax.f32 %v222_v8, 0.0 }
  0x17   : > { %v232_v12 = vmul.f32 %v308_v9, %v223_v10  ;;  %v233_v13 = vmul.f32 %v308_v9, %v224_v11 }
  0x19   : > { %234 = vadd.xlane.f32.xlu0 %v232_v12 }
  0x1d   : > { %236 = vadd.xlane.f32.xlu0 %v233_v13 }
  0xa2   : > { %v235_v14 = vpop.xlane.xlu0 %234 }
  0xa3   : > { %239 = vst.msk [vmem:[%s199_s5] sm:$0xff] %vm238_vm0, %v235_v14 }
  0xa6   : > { %v237_v15 = vpop.xlane.xlu0 %236 }
  0xa7   : > { %240 = vst.msk [vmem:[%s199_s5 + $0x8] sm:$0xff] %vm238_vm0, %v237_v15 }
  0xa8 PF: > { %s14_s15 = sadd.s32 1, %s329_s15  }
  0xa9   : > { %p11_p4 = scmp.ge.s32.totalorder %s14_s15, 4  }
  0xab   :  { %13 = sbr.rel (!%p11_p4) target bundleno = 1 (0x1), region = 66 }

// kernel: dcgan_patch_discriminator.4
= control target key start
LH: loop header
LB: loop body
LE: loop exit
PB: predicated region body
PF: predicated region fallthrough
CT: control target
= control target key end

     0   :  { %s958_s18 = smov 0   ;;  %s1089_s0 = inlined_call_operand.vmem [shape: bf16[32,512], index: 0, kind: input, shape index: {}]   ;;  %s1090_s1 = inlined_call_operand.vmem [shape: bf16[512,128], index: 1, kind: input, shape index: {}]   ;;  %s1091_s2 = inlined_call_operand.vmem [shape: f32[1,512], index: 2, kind: input, shape index: {}]   ;;  %s1092_s3 = inlined_call_operand.vmem [shape: f32[1,512], index: 3, kind: input, shape index: {}]   ;;  %s1093_s4 = inlined_call_operand.vmem [shape: bf16[32,128], index: 4, kind: output, shape index: {0}]   ;;  %s1094_s5 = inlined_call_operand.vmem [shape: f32[2,2,128], index: 5, kind: output, shape index: {1}]  }
   0x1 LB: > { %s964_s19 = sadd.s32 4294967295, %s926_s18   ;;  %p785_p0 = scmp.ge.s32.totalorder %s926_s18, 1  ;;  %s926_s18 = sphi %s958_s18, %s16_s18  }
   0x2   : > { %p192_p1 = scmp.lt.s32.totalorder %s926_s18, 3 }
   0x4   : > { %p193_p2 = pnand %p785_p0, %p192_p1 }
   0x5   : > { %s786_s29 = sshll.u32 (!%p193_p2), %s964_s19, 1  ;;  %p238_p4 = scmp.lt.s32.totalorder (!%p193_p2), %s964_s19, 1 }
   0x6   : > { %196 = sbr.rel (%p193_p2) target bundleno = 267 (0x10b), region = 36  ;;  %p226_p3 = scmp.lt.s32.totalorder (!%p193_p2), %s786_s29, 3 }
   0xb   : > { %v888_v0 = vld [vmem:[%s1090_s1 + $0x78] sm:$0xff]   ;;  %v892_v4 = vld [vmem:[%s1090_s1 + $0x70] sm:$0xff]   ;;  %v896_v8 = vld [vmem:[%s1090_s1 + $0x68] sm:$0xff]   ;;  %v257_v22 = vlaneseq  ;;  %s1096_s29 = smov (!%p226_p3, %s786_s29), 3  ;;  %s1098_s19 = smov (!%p238_p4, %s964_s19), 1  ;;  %vm691_vm0 = vcmask 1040384  }
   0xc   : > { %v889_v1 = vld [vmem:[%s1090_s1 + $0xf8] sm:$0xff]   ;;  %836 = vmatprep.subr.bf16.mxu0 %v888_v0  ;;  %v893_v5 = vld [vmem:[%s1090_s1 + $0xf0] sm:$0xff]   ;;  %v897_v9 = vld [vmem:[%s1090_s1 + $0xe8] sm:$0xff]   ;;  %s828_s30 = sshll.u32 %s1096_s29, 4  ;;  %s790_s25 = sshll.u32 %s1096_s29, 2 }
   0xd   : > { %v890_v2 = vld [vmem:[%s1090_s1 + $0x38] sm:$0xff]   ;;  %858 = vmatprep.subr.bf16.mxu1 %v889_v1  ;;  %v894_v6 = vld [vmem:[%s1090_s1 + $0x30] sm:$0xff]   ;;  %v898_v10 = vld [vmem:[%s1090_s1 + $0x28] sm:$0xff]   ;;  %v258_v27 = vshrl.u32 %v257_v22, 7  ;;  %s230_s14 = scalar_lea.vmem %s1089_s0, %s828_s30  ;;  %s236_s28 = scalar_lea.vmem %s1093_s4, %s790_s25 }
   0xe   : > { %v891_v3 = vld [vmem:[%s1090_s1 + $0xb8] sm:$0xff]   ;;  %837 = vmatpush3.bf16.msra.mxu0 %v890_v2  ;;  %v895_v7 = vld [vmem:[%s1090_s1 + $0xb0] sm:$0xff]   ;;  %v899_v11 = vld [vmem:[%s1090_s1 + $0xa8] sm:$0xff]   ;;  %s791_s29 = sshll.u32 %s1098_s19, 1 }
   0xf   : > { %859 = vmatpush3.bf16.msra.mxu1 %v891_v3  ;;  %838 = vmatprep.subr.bf16.mxu0 %v892_v4  ;;  %v900_v12 = vld [vmem:[%s1090_s1 + $0x60] sm:$0xff]   ;;  %v904_v16 = vld [vmem:[%s1090_s1 + $0x58] sm:$0xff]   ;;  %v908_v20 = vld [vmem:[%s1090_s1 + $0x50] sm:$0xff]   ;;  %v263_v33 = vsub.s32 1, %v258_v27  ;;  %v271_v35 = vsub.s32 3, %v258_v27  ;;  %v259_v39 = vsub.s32 0, %v258_v27  ;;  %s241_s7 = scalar_lea.vmem %s1094_s5, %s791_s29 }
  0x10   : > { %860 = vmatprep.subr.bf16.mxu1 %v893_v5  ;;  %v901_v13 = vld [vmem:[%s1090_s1 + $0xe0] sm:$0xff]   ;;  %v905_v17 = vld [vmem:[%s1090_s1 + $0xd8] sm:$0xff]   ;;  %v909_v21 = vld [vmem:[%s1090_s1 + $0xd0] sm:$0xff]   ;;  %v267_v40 = vsub.s32 2, %v258_v27 }
  0x11   : > { %v902_v14 = vld [vmem:[%s1090_s1 + $0x20] sm:$0xff]   ;;  %v906_v18 = vld [vmem:[%s1090_s1 + $0x18] sm:$0xff]   ;;  %v910_v23 = vld [vmem:[%s1090_s1 + $0x10] sm:$0xff]  }
  0x12   : > { %839 = vmatpush3.bf16.msra.mxu0 %v894_v6  ;;  %v903_v15 = vld [vmem:[%s1090_s1 + $0xa0] sm:$0xff]   ;;  %v907_v19 = vld [vmem:[%s1090_s1 + $0x98] sm:$0xff]   ;;  %v911_v24 = vld [vmem:[%s1090_s1 + $0x90] sm:$0xff]  }
  0x13   : > { %861 = vmatpush3.bf16.msra.mxu1 %v895_v7  ;;  %840 = vmatprep.subr.bf16.mxu0 %v896_v8  ;;  %v912_v25 = vld [vmem:[%s1090_s1 + $0x48] sm:$0xff]   ;;  %v916_v30 = vld [vmem:[%s1090_s1 + $0x40] sm:$0xff]   ;;  %v245_v37 = vld [vmem:[%s230_s14 + $0x10] sm:$0xff] }
  0x14   : > { %862 = vmatprep.subr.bf16.mxu1 %v897_v9  ;;  %v913_v26 = vld [vmem:[%s1090_s1 + $0xc8] sm:$0xff]   ;;  %v917_v31 = vld [vmem:[%s1090_s1 + $0xc0] sm:$0xff]   ;;  %v251_v43 = vunpack.c.l.bf16 %v245_v37  ;;  %v252_v44 = vunpack.c.h.bf16 %v245_v37  ;;  %v246_v47 = vld [vmem:[%s230_s14 + $0x18] sm:$0xff] }
  0x15   : > { %v914_v28 = vld [vmem:[%s1090_s1 + $0x8] sm:$0xff]   ;;  %v918_v32 = vld [vmem:[%s1090_s1] sm:$0xff]   ;;  %v253_v52 = vunpack.c.l.bf16 %v246_v47  ;;  %v254_v53 = vunpack.c.h.bf16 %v246_v47 }
  0x16   : > { %841 = vmatpush3.bf16.msra.mxu0 %v898_v10  ;;  %v915_v29 = vld [vmem:[%s1090_s1 + $0x88] sm:$0xff]   ;;  %v919_v34 = vld [vmem:[%s1090_s1 + $0x80] sm:$0xff]  }
  0x17   : > { %863 = vmatpush3.bf16.msra.mxu1 %v899_v11  ;;  %842 = vmatprep.subr.bf16.mxu0 %v900_v12  ;;  %v243_v36 = vld [vmem:[%s230_s14] sm:$0xff]  ;;  %v244_v46 = vld [vmem:[%s230_s14 + $0x8] sm:$0xff] }
  0x18   : > { %864 = vmatprep.subr.bf16.mxu1 %v901_v13  ;;  %v255_v38 = vld [vmem:[%s1091_s2] sm:$0xf]  ;;  %v247_v41 = vunpack.c.l.bf16 %v243_v36  ;;  %v248_v42 = vunpack.c.h.bf16 %v243_v36  ;;  %v249_v50 = vunpack.c.l.bf16 %v244_v46  ;;  %v250_v51 = vunpack.c.h.bf16 %v244_v46 }
  0x19   : > { %v285_v45 = vld [vmem:[%s1092_s3] sm:$0xf]  ;;  %v264_v48 = vrot.slane %v255_v38, %v263_v33  ;;  %v272_v54 = vrot.slane %v255_v38, %v271_v35  ;;  %v260_v58 = vrot.slane %v255_v38, %v259_v39  ;;  %v268_v62 = vrot.slane %v255_v38, %v267_v40 }
  0x1a   : > { %843 = vmatpush3.bf16.msra.mxu0 %v902_v14  ;;  %v294_v49 = vrot.slane %v285_v45, %v263_v33  ;;  %v302_v55 = vrot.slane %v285_v45, %v271_v35  ;;  %v290_v59 = vrot.slane %v285_v45, %v259_v39  ;;  %v298_v63 = vrot.slane %v285_v45, %v267_v40 }
  0x1b   : > { %865 = vmatpush3.bf16.msra.mxu1 %v903_v15  ;;  %844 = vmatprep.subr.bf16.mxu0 %v904_v16  ;;  %v278_v56 = vmul.f32 %v264_v48, %v248_v42  ;;  %v282_v57 = vmul.f32 %v264_v48, %v252_v44  ;;  %v280_v60 = vmul.f32 %v272_v54, %v250_v51 }
  0x1c   : > { %866 = vmatprep.subr.bf16.mxu1 %v905_v17  ;;  %v284_v61 = vmul.f32 %v272_v54, %v254_v53  ;;  %v277_v2 = vmul.f32 %v260_v58, %v247_v41  ;;  %v281_v3 = vmul.f32 %v260_v58, %v251_v43  ;;  %v279_v6 = vmul.f32 %v268_v62, %v249_v50 }
  0x1d   : > { %v308_v0 = vadd.f32 %v294_v49, %v278_v56  ;;  %v312_v1 = vadd.f32 %v294_v49, %v282_v57  ;;  %v310_v4 = vadd.f32 %v302_v55, %v280_v60  ;;  %v283_v7 = vmul.f32 %v268_v62, %v253_v52 }
  0x1e   : > { %845 = vmatpush3.bf16.msra.mxu0 %v906_v18  ;;  %v314_v5 = vadd.f32 %v302_v55, %v284_v61  ;;  %v307_v10 = vadd.f32 %v290_v59, %v277_v2  ;;  %v311_v11 = vadd.f32 %v290_v59, %v281_v3  ;;  %v309_v14 = vadd.f32 %v298_v63, %v279_v6 }
  0x1f   : > { %867 = vmatpush3.bf16.msra.mxu1 %v907_v19  ;;  %846 = vmatprep.subr.bf16.mxu0 %v908_v20  ;;  %v316_v8 = vmax.f32 %v308_v0, 0.0  ;;  %v320_v9 = vmax.f32 %v312_v1, 0.0  ;;  %v318_v12 = vmax.f32 %v310_v4, 0.0  ;;  %v313_v15 = vadd.f32 %v298_v63, %v283_v7 }
  0x20   : > { %868 = vmatprep.subr.bf16.mxu1 %v909_v21  ;;  %v322_v13 = vmax.f32 %v314_v5, 0.0  ;;  %v315_v17 = vmax.f32 %v307_v10, 0.0  ;;  %v319_v18 = vmax.f32 %v311_v11, 0.0  ;;  %v317_v20 = vmax.f32 %v309_v14, 0.0 }
  0x21   : > { %v324_v16 = vpack.c.bf16 %v320_v9, %v316_v8  ;;  %v321_v21 = vmax.f32 %v313_v15, 0.0 }
  0x22   : > { %847 = vmatpush3.bf16.msra.mxu0 %v910_v23  ;;  %v326_v19 = vpack.c.bf16 %v322_v13, %v318_v12  ;;  %v323_v22 = vpack.c.bf16 %v319_v18, %v315_v17 }
  0x23   : > { %869 = vmatpush3.bf16.msra.mxu1 %v911_v24  ;;  %848 = vmatprep.subr.bf16.mxu0 %v912_v25  ;;  %v325_v23 = vpack.c.bf16 %v321_v21, %v317_v20 }
  0x24   : > { %870 = vmatprep.subr.bf16.mxu1 %v913_v26  ;;  %615 = vmatprep.mubr.bf16.mxu0 %v324_v16 }
  0x25   : > { %656 = vmatprep.mubr.bf16.mxu1 %v326_v19 }
  0x26   : > { %849 = vmatpush3.bf16.msra.mxu0 %v914_v28 }
  0x27   : > { %871 = vmatpush3.bf16.msra.mxu1 %v915_v29  ;;  %850 = vmatprep.subr.bf16.mxu0 %v916_v30 }
  0x28   : > { %872 = vmatprep.subr.bf16.mxu1 %v917_v31 }
  0x2a   : > { %851 = vmatpush3.bf16.msra.mxu0 %v918_v32 }
  0x2b   : > { %873 = vmatpush3.bf16.msra.mxu1 %v919_v34 }
  0x2d   : > { %616 = vmatmul.mubr.bf16.vlgmr.msra.gmra.mxu0 %v323_v22 }
  0x2e   : > { %657 = vmatmul.mubr.bf16.vlgmr.msra.gmra.mxu1 %v325_v23 }
  0xed   : > { %v852_v24 = vpop.f32.mrf.mxu0 }
  0xee   : > { %v874_v25 = vpop.f32.mrf.mxu1 }
  0xef   : > { %v853_v26 = vpop.f32.mrf.mxu0 }
  0xf0   : > { %v875_v27 = vpop.f32.mrf.mxu1  ;;  %v854_v28 = vadd.f32 %v853_v26, %v852_v24 }
  0xf1   : > { %v876_v29 = vadd.f32 %v875_v27, %v874_v25  ;;  %v855_v30 = vpop.f32.mrf.mxu0 }
  0xf2   : > { %v877_v31 = vpop.f32.mrf.mxu1 }
  0xf3   : > { %v856_v32 = vpop.f32.mrf.mxu0  ;;  %v659_v35 = vadd.f32 %v876_v29, %v854_v28 }
  0xf4   : > { %v857_v33 = vadd.f32 %v856_v32, %v855_v30  ;;  %v878_v34 = vpop.f32.mrf.mxu1 }
  0xf5   : > { %v879_v36 = vadd.f32 %v878_v34, %v877_v31  ;;  %v682_v38 = vmul.f32 %v659_v35, %v659_v35 }
  0xf7   : > { %v662_v37 = vadd.f32 %v879_v36, %v857_v33 }
  0xf9   : > { %v834_v39 = vpack.c.bf16 %v662_v37, %v659_v35  ;;  %v675_v40 = vadd.f32 %v662_v37, %v659_v35  ;;  %v683_v41 = vmul.f32 %v662_v37, %v662_v37 }
  0xfb   : > { %835 = vst [vmem:[%s236_s28] sm:$0xff] %v834_v39   ;;  %v676_v42 = vrot.slane %v675_v40, 4  ;;  %v684_v43 = vadd.f32 %v683_v41, %v682_v38 }
  0xfd   : > { %v677_v44 = vadd.f32 %v676_v42, %v675_v40  ;;  %v685_v45 = vrot.slane %v684_v43, 4 }
  0xff   : > { %v678_v46 = vrot.slane %v677_v44, 2  ;;  %v686_v47 = vadd.f32 %v685_v45, %v684_v43 }
 0x101   : > { %v679_v48 = vadd.f32 %v678_v46, %v677_v44  ;;  %v687_v49 = vrot.slane %v686_v47, 2 }
 0x103   : > { %v680_v50 = vrot.slane %v679_v48, 1  ;;  %v688_v51 = vadd.f32 %v687_v49, %v686_v47 }
 0x105   : > { %v689_v52 = vrot.slane %v688_v51, 1  ;;  %v681_v53 = vadd.f32 %v680_v50, %v679_v48 }
 0x107   : > { %v690_v54 = vadd.f32 %v689_v52, %v688_v51 }
 0x109   : > { %v692_v55 = vsel %vm691_vm0, %v681_v53, %v690_v54 }
 0x10a   : > { %693 = vst [vmem:[%s241_s7] sm:$0x3] %v692_v55 }
 0x10b PF: > { %s16_s18 = sadd.s32 1, %s926_s18  }
 0x10c   : > { %p13_p5 = scmp.ge.s32.totalorder %s16_s18, 4  }
 0x10e   :  { %15 = sbr.rel (!%p13_p5) target bundleno = 1 (0x1), region = 78 }

</bundles_post_ra>
